<compile_context>
chip_gen: v7x
topology: tpu7x:2x2x1
jax: 0.10.0
libtpu: 0.0.40
codegen_flags: <defaults>
</compile_context>

<pallas_src>
import jax
import jax.numpy as jnp
from jax.experimental import pallas as pl
from jax.experimental.pallas import tpu as pltpu

LANE = 128
SUBLANE = 8


def _round_up(x, m):
    return (x + m - 1) // m * m


# --------------------------------------------------------------------------------------
# Kernels: pure adjacency propagation (bf16 x bf16 on the MXU, f32 accumulation)
# --------------------------------------------------------------------------------------
def _prop_relu_kernel(adj_ref, xw_ref, b1_ref, h_ref):
    # H_rows = relu(A_rows @ (X @ W1) + b1); dropout(p=0) / inference -> identity.
    acc = jnp.dot(adj_ref[...], xw_ref[...], preferred_element_type=jnp.float32)
    h_ref[...] = jnp.maximum(acc + b1_ref[...], 0.0).astype(h_ref.dtype)


def _prop_logsoftmax_kernel(adj_ref, hw_ref, b2_ref, out_ref):
    # out_rows = log_softmax(A_rows @ (H @ W2) + b2); padded lanes carry b2 = -1e30,
    # so they contribute exp(-huge)=0 to the normalizer (no iota/where needed).
    logits = jnp.dot(adj_ref[...], hw_ref[...],
                     preferred_element_type=jnp.float32) + b2_ref[...]
    m = jnp.max(logits, axis=-1, keepdims=True)
    z = logits - m
    lse = jnp.log(jnp.sum(jnp.exp(z), axis=-1, keepdims=True))
    out_ref[...] = (z - lse).astype(out_ref.dtype)


# --------------------------------------------------------------------------------------
# Graph-static preprocessing (do once per graph, reuse across forward calls)
# --------------------------------------------------------------------------------------
def normalized_adjacency(edge_index, num_nodes):
    """Dense D^-1/2 (A + I) D^-1/2 (f32). Static per graph."""
    src, dst = edge_index[0], edge_index[1]
    a = jnp.zeros((num_nodes, num_nodes), jnp.float32).at[dst, src].add(1.0)
    a = a + jnp.eye(num_nodes, dtype=jnp.float32)
    dinv = jax.lax.rsqrt(jnp.sum(a, axis=1))
    return dinv[:, None] * a * dinv[None, :]


def _vmem_limits():
    """Physical VMEM and the scoped limit handed to the compiler (25% headroom)."""
    try:
        phys = int(pltpu.get_tpu_info().vmem_capacity_bytes)
    except Exception:
        phys = 128 * 1024 * 1024
    # ~96 MiB on v5e/v6e (128 MiB physical), ~48 MiB on v7x (64 MiB physical).
    limit = min(phys * 3 // 4, 100 * 1024 * 1024)
    return phys, limit


def _choose_row_tile(num_nodes, c_hid_p, c_out_p, vmem_limit, requested=None):
    """Largest row tile such that the double-buffered adjacency stream + single-
    buffered resident constants + double-buffered output tile fit the VMEM limit."""
    n_min = _round_up(num_nodes, SUBLANE)
    tm = _round_up(requested, SUBLANE) if requested else 1024
    tm = min(tm, n_min)
    while tm > SUBLANE:
        n_pad = _round_up(num_nodes, tm)
        adj_stream = 2 * tm * n_pad * 2                          # Buffered(2) bf16 adj tile
        resident = max(
            n_pad * c_hid_p * 2 + 2 * tm * c_hid_p * 2,          # XW (bf16) + H out (bf16, dbuf)
            n_pad * c_out_p * 2 + 2 * tm * c_out_p * 4,          # HW (bf16) + out (f32, dbuf)
        )
        if adj_stream + resident + (2 << 20) <= vmem_limit:
            break
        tm = max(SUBLANE, _round_up(tm // 2, SUBLANE))
    return max(tm, SUBLANE)


def gcn_prepare(edge_index, num_nodes, hidden_channels, out_channels, *, row_tile=None):
    """Build the padded bf16 adjacency + tiling config ONCE per graph."""
    adj = normalized_adjacency(edge_index, num_nodes)
    c_hid_p = _round_up(hidden_channels, LANE)
    c_out_p = _round_up(out_channels, LANE)
    _, vmem_limit = _vmem_limits()
    tm = _choose_row_tile(num_nodes, c_hid_p, c_out_p, vmem_limit, requested=row_tile)
    n_pad = _round_up(num_nodes, tm)
    adj_p = jnp.zeros((n_pad, n_pad), jnp.bfloat16).at[:num_nodes, :num_nodes].set(
        adj.astype(jnp.bfloat16))
    # TODO(synk): on v7x the MXU accepts fp8 natively; storing adj_p as e4m3 would halve
    # the dominant HBM stream (needs accuracy validation on real graphs), not done here.
    return dict(adj_p=adj_p, tm=int(tm), n_pad=int(n_pad), num_nodes=int(num_nodes),
                vmem_limit=int(vmem_limit))


# --------------------------------------------------------------------------------------
# Streamed propagation helper
# --------------------------------------------------------------------------------------
def _propagate(kernel, adj_p, consts, out_shape, tm, n_pad, cparams, cost):
    n_tiles = n_pad // tm
    adj_spec = pl.BlockSpec((tm, n_pad), lambda i: (i, 0))
    out_spec = pl.BlockSpec((tm, out_shape.shape[1]), lambda i: (i, 0))

    def call(const_pipeline_mode):
        in_specs = [adj_spec] + [
            pl.BlockSpec(c.shape, lambda i: (0, 0), pipeline_mode=const_pipeline_mode)
            for c in consts
        ]
        return pl.pallas_call(
            kernel,
            out_shape=out_shape,
            grid=(n_tiles,),
            in_specs=in_specs,
            out_specs=out_spec,
            compiler_params=cparams,
            cost_estimate=cost,
        )(adj_p, *consts)

    try:
        # Constant-index-map inputs never change across the row-tile grid ->
        # single-buffer them to cut their VMEM footprint in half.
        return call(pl.Buffered(1))
    except Exception:
        # Fall back to default double buffering if this Pallas build rejects Buffered(1).
        return call(None)


# --------------------------------------------------------------------------------------
# Forward
# --------------------------------------------------------------------------------------
def gcn_forward(x, prep, w1, b1, w2, b2):
    adj_p = prep["adj_p"]
    tm, n_pad, N = prep["tm"], prep["n_pad"], prep["num_nodes"]
    vmem_limit = prep["vmem_limit"]

    c_in = x.shape[1]
    c_hid = w1.shape[1]
    c_out = w2.shape[1]
    c_hid_p = _round_up(c_hid, LANE)
    c_out_p = _round_up(c_out, LANE)

    # Pad node rows and channel lanes; everything the MXU touches is bf16.
    x_p = jnp.zeros((n_pad, c_in), jnp.bfloat16).at[:N].set(x.astype(jnp.bfloat16))
    w1_b = jnp.zeros((c_in, c_hid_p), jnp.bfloat16).at[:, :c_hid].set(w1.astype(jnp.bfloat16))
    w2_b = jnp.zeros((c_hid_p, c_out_p), jnp.bfloat16).at[:c_hid, :c_out].set(
        w2.astype(jnp.bfloat16))
    b1_p = jnp.zeros((1, c_hid_p), jnp.float32).at[0, :c_hid].set(b1.astype(jnp.float32))
    # Fold the padded-column mask into the bias (padded logits = -1e30).
    b2_p = jnp.full((1, c_out_p), -1e30, jnp.float32).at[0, :c_out].set(
        b2.astype(jnp.float32))

    cparams = pltpu.CompilerParams(
        dimension_semantics=("parallel",),      # shard row tiles across megacore TCs
        vmem_limit_bytes=vmem_limit,
    )

    # Hoisted feature matmul #1 (done once, not per row tile).
    xw = jnp.dot(x_p, w1_b, preferred_element_type=jnp.float32).astype(jnp.bfloat16)

    # Pass 1: H = relu(A @ XW + b1), kept bf16 and lane-dense.
    h = _propagate(
        _prop_relu_kernel, adj_p, (xw, b1_p),
        jax.ShapeDtypeStruct((n_pad, c_hid_p), jnp.bfloat16),
        tm, n_pad, cparams,
        pl.CostEstimate(
            flops=2 * n_pad * n_pad * c_hid_p,
            transcendentals=0,
            bytes_accessed=adj_p.size * 2 + 2 * n_pad * c_hid_p * 2,
        ),
    )

    # Hoisted feature matmul #2.
    hw = jnp.dot(h, w2_b, preferred_element_type=jnp.float32).astype(jnp.bfloat16)

    # Pass 2: out = log_softmax(A @ HW + b2) over the real output columns.
    out_p = _propagate(
        _prop_logsoftmax_kernel, adj_p, (hw, b2_p),
        jax.ShapeDtypeStruct((n_pad, c_out_p), jnp.float32),
        tm, n_pad, cparams,
        pl.CostEstimate(
            flops=2 * n_pad * n_pad * c_out_p,
            transcendentals=n_pad * c_out_p,
            bytes_accessed=adj_p.size * 2 + n_pad * c_out_p * 2 + n_pad * c_out_p * 4,
        ),
    )

    return out_p[:N, :c_out]


# --------------------------------------------------------------------------------------
# Plain-JAX reference mirroring the kernel's bf16 casts (f32 accumulation)
# --------------------------------------------------------------------------------------
def _reference(x, edge_index, w1, b1, w2, b2):
    N = x.shape[0]
    adj = normalized_adjacency(edge_index, N).astype(jnp.bfloat16)
    xw = jnp.dot(x.astype(jnp.bfloat16), w1.astype(jnp.bfloat16),
                 preferred_element_type=jnp.float32).astype(jnp.bfloat16)
    h = jnp.maximum(jnp.dot(adj, xw, preferred_element_type=jnp.float32) + b1, 0.0)
    h = h.astype(jnp.bfloat16)
    hw = jnp.dot(h, w2.astype(jnp.bfloat16),
                 preferred_element_type=jnp.float32).astype(jnp.bfloat16)
    logits = jnp.dot(adj, hw, preferred_element_type=jnp.float32) + b2
    return jax.nn.log_softmax(logits, axis=-1)


if __name__ == "__main__":
    key = jax.random.PRNGKey(0)
    k1, k2, kx = jax.random.split(key, 3)

    N, C_IN, C_HID, C_OUT = 16, 8, 32, 8

    # deterministic "glorot-like" weights; zero biases (PyG GCNConv default)
    w1 = (jax.random.normal(k1, (C_IN, C_HID), jnp.float32)
          * jnp.sqrt(2.0 / (C_IN + C_HID)))
    b1 = jnp.zeros((C_HID,), jnp.float32)
    w2 = (jax.random.normal(k2, (C_HID, C_OUT), jnp.float32)
          * jnp.sqrt(2.0 / (C_HID + C_OUT)))
    b2 = jnp.zeros((C_OUT,), jnp.float32)

    x = jax.random.normal(kx, (N, C_IN), jnp.float32)

    # symmetric ring graph: i <-> (i+1) mod N   -> edge_index (2, 2N)
    idx = jnp.arange(N, dtype=jnp.int32)
    nxt = (idx + 1) % N
    edge_index = jnp.stack(
        [jnp.concatenate([idx, nxt]), jnp.concatenate([nxt, idx])], axis=0)

    ref = _reference(x, edge_index, w1, b1, w2, b2)

    # 1) default (single-tile) path
    prep = gcn_prepare(edge_index, N, C_HID, C_OUT)
    out = jax.block_until_ready(gcn_forward(x, prep, w1, b1, w2, b2))
    assert out.shape == (N, C_OUT)
    assert bool(jnp.all(jnp.isfinite(out)))
    assert jnp.allclose(out, ref, atol=2e-2, rtol=2e-2), float(jnp.max(jnp.abs(out - ref)))

    # 2) multi-tile streaming path (row_tile=8 -> 2 grid steps): exercises the
    #    pipelined adjacency stream and the padded-column log_softmax masking.
    prep_mt = gcn_prepare(edge_index, N, C_HID, C_OUT, row_tile=8)
    out_mt = jax.block_until_ready(gcn_forward(x, prep_mt, w1, b1, w2, b2))
    assert jnp.allclose(out_mt, ref, atol=2e-2, rtol=2e-2), float(
        jnp.max(jnp.abs(out_mt - ref)))

    print("KERNEL_OK")
</pallas_src>

<mosaic_0001>
module attributes {stable_mosaic.version = 11 : i64} {
  func.func @_prop_relu_kernel(%arg0: i32, %arg1: memref<16x16xbf16, #tpu.memory_space<vmem>>, %arg2: memref<16x128xbf16, #tpu.memory_space<vmem>>, %arg3: memref<1x128xf32, #tpu.memory_space<vmem>>, %arg4: memref<16x128xbf16, #tpu.memory_space<vmem>>) attributes {dimension_semantics = [#tpu.dimension_semantics<parallel>], iteration_bounds = array<i64: 1>, scalar_prefetch = 0 : i64, scratch_operands = 0 : i64, tpu.core_type = #tpu.core_type<tc>, window_params = [{transform_indices = @transform_0, window_bounds = array<i64: 16, 16>}, {pipeline_mode = #tpu.pipeline_mode<synchronous>, transform_indices = @transform_1, window_bounds = array<i64: 16, 128>}, {pipeline_mode = #tpu.pipeline_mode<synchronous>, transform_indices = @transform_2, window_bounds = array<i64: 1, 128>}, {transform_indices = @transform_3, window_bounds = array<i64: 16, 128>}]} {
    %c0 = arith.constant 0 : index
    %c0_0 = arith.constant 0 : index
    %0 = vector.load %arg1[%c0, %c0_0] : memref<16x16xbf16, #tpu.memory_space<vmem>>, vector<16x16xbf16>
    %c0_1 = arith.constant 0 : index
    %c0_2 = arith.constant 0 : index
    %1 = vector.load %arg2[%c0_1, %c0_2] : memref<16x128xbf16, #tpu.memory_space<vmem>>, vector<16x128xbf16>
    %cst = arith.constant dense<0.000000e+00> : vector<16x128xf32>
    %2 = tpu.matmul %0, %1, %cst {dimension_numbers = #tpu.dot_dimension_numbers<[1], [0], [0], [1], [0, 0, 1, 1], [], []>} : vector<16x16xbf16>, vector<16x128xbf16>, vector<16x128xf32> -> vector<16x128xf32>
    %c0_3 = arith.constant 0 : index
    %c0_4 = arith.constant 0 : index
    %3 = vector.load %arg3[%c0_3, %c0_4] : memref<1x128xf32, #tpu.memory_space<vmem>>, vector<1x128xf32>
    %4 = vector.broadcast %3 : vector<1x128xf32> to vector<16x128xf32>
    %5 = arith.addf %2, %4 : vector<16x128xf32>
    %cst_5 = arith.constant 0.000000e+00 : f32
    %6 = vector.broadcast %cst_5 : f32 to vector<16x128xf32>
    %7 = arith.maximumf %5, %6 : vector<16x128xf32>
    %8 = arith.truncf %7 : vector<16x128xf32> to vector<16x128xbf16>
    %c0_6 = arith.constant 0 : index
    %c0_7 = arith.constant 0 : index
    %9 = vector.load %arg4[%c0_6, %c0_7] : memref<16x128xbf16, #tpu.memory_space<vmem>>, vector<16x128xbf16>
    tpu.vector_store %arg4[%c0_6, %c0_7], %8 {strides = array<i32>} : memref<16x128xbf16, #tpu.memory_space<vmem>>, vector<16x128xbf16>,
    return
  }
  func.func @transform_0(%arg0: i32) -> (i32, i32) {
    %c0_i32 = arith.constant 0 : i32
    %c0_i32_0 = arith.constant 0 : i32
    return %arg0, %c0_i32 : i32, i32
  }
  func.func @transform_1(%arg0: i32) -> (i32, i32) {
    %c0_i32 = arith.constant 0 : i32
    %c0_i32_0 = arith.constant 0 : i32
    %c0_i32_1 = arith.constant 0 : i32
    return %c0_i32, %c0_i32_0 : i32, i32
  }
  func.func @transform_2(%arg0: i32) -> (i32, i32) {
    %c0_i32 = arith.constant 0 : i32
    %c0_i32_0 = arith.constant 0 : i32
    %c0_i32_1 = arith.constant 0 : i32
    return %c0_i32, %c0_i32_0 : i32, i32
  }
  func.func @transform_3(%arg0: i32) -> (i32, i32) {
    %c0_i32 = arith.constant 0 : i32
    %c0_i32_0 = arith.constant 0 : i32
    return %arg0, %c0_i32 : i32, i32
  }
}

module attributes {stable_mosaic.version = 11 : i64} {
  func.func @_prop_relu_kernel(%arg0: i32, %arg1: memref<16x16xbf16, #tpu.memory_space<vmem>>, %arg2: memref<16x128xbf16, #tpu.memory_space<vmem>>, %arg3: memref<1x128xf32, #tpu.memory_space<vmem>>, %arg4: memref<16x128xbf16, #tpu.memory_space<vmem>>) attributes {dimension_semantics = [#tpu.dimension_semantics<parallel>], iteration_bounds = array<i64: 1>, scalar_prefetch = 0 : i64, scratch_operands = 0 : i64, tpu.core_type = #tpu.core_type<tc>, window_params = [{transform_indices = @transform_0, window_bounds = array<i64: 16, 16>}, {pipeline_mode = #tpu.pipeline_mode<synchronous>, transform_indices = @transform_1, window_bounds = array<i64: 16, 128>}, {pipeline_mode = #tpu.pipeline_mode<synchronous>, transform_indices = @transform_2, window_bounds = array<i64: 1, 128>}, {transform_indices = @transform_3, window_bounds = array<i64: 16, 128>}]} {
    %c0 = arith.constant 0 : index
    %c0_0 = arith.constant 0 : index
    %0 = vector.load %arg1[%c0, %c0_0] : memref<16x16xbf16, #tpu.memory_space<vmem>>, vector<16x16xbf16>
    %c0_1 = arith.constant 0 : index
    %c0_2 = arith.constant 0 : index
    %1 = vector.load %arg2[%c0_1, %c0_2] : memref<16x128xbf16, #tpu.memory_space<vmem>>, vector<16x128xbf16>
    %cst = arith.constant dense<0.000000e+00> : vector<16x128xf32>
    %2 = tpu.matmul %0, %1, %cst {dimension_numbers = #tpu.dot_dimension_numbers<[1], [0], [0], [1], [0, 0, 1, 1], [], []>} : vector<16x16xbf16>, vector<16x128xbf16>, vector<16x128xf32> -> vector<16x128xf32>
    %c0_3 = arith.constant 0 : index
    %c0_4 = arith.constant 0 : index
    %3 = vector.load %arg3[%c0_3, %c0_4] : memref<1x128xf32, #tpu.memory_space<vmem>>, vector<1x128xf32>
    %4 = vector.broadcast %3 : vector<1x128xf32> to vector<16x128xf32>
    %5 = arith.addf %2, %4 : vector<16x128xf32>
    %cst_5 = arith.constant 0.000000e+00 : f32
    %6 = vector.broadcast %cst_5 : f32 to vector<16x128xf32>
    %7 = arith.maximumf %5, %6 : vector<16x128xf32>
    %8 = arith.truncf %7 : vector<16x128xf32> to vector<16x128xbf16>
    %c0_6 = arith.constant 0 : index
    %c0_7 = arith.constant 0 : index
    %9 = vector.load %arg4[%c0_6, %c0_7] : memref<16x128xbf16, #tpu.memory_space<vmem>>, vector<16x128xbf16>
    tpu.vector_store %arg4[%c0_6, %c0_7], %8 {strides = array<i32>} : memref<16x128xbf16, #tpu.memory_space<vmem>>, vector<16x128xbf16>,
    return
  }
  func.func @transform_0(%arg0: i32) -> (i32, i32) {
    %c0_i32 = arith.constant 0 : i32
    %c0_i32_0 = arith.constant 0 : i32
    return %arg0, %c0_i32 : i32, i32
  }
  func.func @transform_1(%arg0: i32) -> (i32, i32) {
    %c0_i32 = arith.constant 0 : i32
    %c0_i32_0 = arith.constant 0 : i32
    %c0_i32_1 = arith.constant 0 : i32
    return %c0_i32, %c0_i32_0 : i32, i32
  }
  func.func @transform_2(%arg0: i32) -> (i32, i32) {
    %c0_i32 = arith.constant 0 : i32
    %c0_i32_0 = arith.constant 0 : i32
    %c0_i32_1 = arith.constant 0 : i32
    return %c0_i32, %c0_i32_0 : i32, i32
  }
  func.func @transform_3(%arg0: i32) -> (i32, i32) {
    %c0_i32 = arith.constant 0 : i32
    %c0_i32_0 = arith.constant 0 : i32
    return %arg0, %c0_i32 : i32, i32
  }
}

</mosaic_0001>

<bundles_post_ra>
// kernel: tpu_custom_call.1
= control target key start
LH: loop header
LB: loop body
LE: loop exit
PB: predicated region body
PF: predicated region fallthrough
CT: control target
= control target key end

     0   :  { %8 = vsyncpa [#allocation3], 0  ;;  %s369_s0 = inlined_call_operand.hbm [shape: bf16[16,16], index: 0, kind: input, shape index: {}]   ;;  %s370_s1 = inlined_call_operand.hbm [shape: bf16[16,128], index: 1, kind: input, shape index: {}]   ;;  %s371_s2 = inlined_call_operand.hbm [shape: f32[1,128], index: 2, kind: input, shape index: {}]   ;;  %s372_s3 = inlined_call_operand.hbm [shape: bf16[16,128], index: 3, kind: output, shape index: {}]  }
   0x1   :  { %9 = vsyncpa [#allocation6], 0 }
   0x2   :  { %10 = vsyncpa [#allocation4], 0  ;;  %s277_s12 = smov [#allocation5]   ;;  %s278_s14 = smov [#allocation2]  }
   0x3   :  { %s28_s13 = sshll.u32 %s277_s12, 4  ;;  %s16_s15 = sshll.u32 %s278_s14, 4  ;;  %s29_s13 = int_to_ptr.vmem [resolvable:$true] %s28_s13  ;;  %s305_s15 = int_to_ptr.vmem [resolvable:$true] %s16_s15 }
   0x4   :  { %s183_s18 = scalar_lea.hbm %s370_s1, 128 }
   0x5   :  { %p184_p0 = scmp.ne.s32.totalorder %s370_s1, %s183_s18  ;;  %p187_p1 = scmp.lt.u32.totalorder %s183_s18, %s370_s1 }
   0x7   :  { %p189_p2 = pnand %p187_p1, %p184_p0 }
   0x9   :  { %192 = shalt.err (!%p189_p2)
}
   0xa   :  { %s193_s23 = scalar_lea.vmem %s29_s13, 128  ;;  %p198_p4 = scmp.lt.s32.totalorder %s29_s13, %s29_s13 }
   0xb   :  { %p194_p3 = scmp.ne.s32.totalorder %s29_s13, %s193_s23  ;;  %p199_p5 = scmp.lt.s32.totalorder %s193_s23, %s193_s23 }
   0xd   :  { %p200_p6 = por %p199_p5, %p198_p4 }
   0xf   :  { %p201_p7 = pnand %p200_p6, %p194_p3 }
  0x11   :  { %204 = shalt.err (!%p201_p7)
}
  0x12   :  { %s279_s24 = smov 64   ;;  %s280_s25 = smov 4  }
  0x13   :  { %34 = dma.hbm_to_vmem [thread:$0]  %s370_s1, 128, %s29_s13, [#allocation6], %s279_s24, %s279_s24, %s280_s25  }
  0x14   :  { %s205_s30 = scalar_lea.hbm %s369_s0, 128 }
  0x15   :  { %p206_p8 = scmp.ne.s32.totalorder %s369_s0, %s205_s30  ;;  %p209_p9 = scmp.lt.u32.totalorder %s205_s30, %s369_s0 }
  0x17   :  { %p211_p10 = pnand %p209_p9, %p206_p8 }
  0x19   :  { %214 = shalt.err (!%p211_p10)
}
  0x1a   :  { %s215_s8 = scalar_lea.vmem %s305_s15, 128  ;;  %p220_p12 = scmp.lt.s32.totalorder %s305_s15, %s305_s15 }
  0x1b   :  { %p216_p11 = scmp.ne.s32.totalorder %s305_s15, %s215_s8  ;;  %p221_p13 = scmp.lt.s32.totalorder %s215_s8, %s215_s8 }
  0x1d   :  { %p222_p0 = por %p221_p13, %p220_p12 }
  0x1f   :  { %p223_p1 = pnand %p222_p0, %p216_p11 }
  0x21   :  { %226 = shalt.err (!%p223_p1)
}
  0x22   :  { %22 = dma.hbm_to_vmem [thread:$0]  %s369_s0, 128, %s305_s15, [#allocation3], %s279_s24, %s279_s24, %s280_s25  }
  0x23   :  { %s281_s10 = smov [#allocation7]   ;;  %s227_s14 = scalar_lea.hbm %s371_s2, 16 }
  0x24   :  { %s41_s11 = sshll.u32 %s281_s10, 4  ;;  %p228_p2 = scmp.ne.s32.totalorder %s371_s2, %s227_s14  ;;  %s42_s11 = int_to_ptr.vmem [resolvable:$true] %s41_s11 }
  0x25   :  { %p231_p3 = scmp.lt.u32.totalorder %s227_s14, %s371_s2 }
  0x27   :  { %p233_p4 = pnand %p231_p3, %p228_p2 }
  0x29   :  { %236 = shalt.err (!%p233_p4)
}
  0x2a   :  { %s237_s20 = scalar_lea.vmem %s42_s11, 16  ;;  %s241_s0 = scalar_lea.vmem %s42_s11, 32 }
  0x2b   :  { %p238_p5 = scmp.ne.s32.totalorder %s42_s11, %s237_s20  ;;  %p242_p6 = scmp.lt.s32.totalorder %s42_s11, %s42_s11 }
  0x2c   :  { %p243_p7 = scmp.lt.s32.totalorder %s241_s0, %s237_s20 }
  0x2e   :  { %p244_p8 = por %p243_p7, %p242_p6 }
  0x30   :  { %p245_p9 = pnand %p244_p8, %p238_p5 }
  0x32   :  { %248 = shalt.err (!%p245_p9)
}
  0x33   :  { %44 = dma.hbm_to_vmem [thread:$0]  %s371_s2, 16, %s42_s11, [#allocation6]  }
  0x34   :  { %271 = dma.done.wait [#allocation3], 128  }
  0x35   :  { %272 = vsyncadd [#allocation3], 4294967168 }
  0x36   :  { %273 = dma.done.wait [#allocation6], 144  }
  0x37   :  { %274 = vsyncadd [#allocation6], 4294967152  ;;  %v282_v0 = vmov 0.0   ;;  %vm283_vm0 = vmmov 0   ;;  %v181_v1 = vld [vmem:[#allocation5] sm:$0xff]   ;;  %v182_v2 = vld [vmem:[#allocation2] sm:$0xff]  }
  0x38   :  { %167 = vmatprep.subr.bf16.mxu0 %v282_v0  ;;  %169 = vmatprep.mubr.msk.bf16.mxu0 %vm283_vm0, %v282_v0  ;;  %vm77_vm1 = vcmask 130048   ;;  %v152_v3 = vld [vmem:[#allocation7] ss:$0 sm:$0xff]  ;;  %s284_s2 = smov [#allocation8]  }
  0x39   :  { %168 = vmatpush3.bf16.msra.mxu0 %v181_v1  ;;  %s139_s22 = sshll.u32 %s284_s2, 4  ;;  %s140_s22 = int_to_ptr.vmem [resolvable:$true] %s139_s22 }
  0x3a   :  { %s249_s23 = scalar_lea.vmem %s140_s22, 128  ;;  %p254_p11 = scmp.lt.s32.totalorder %s140_s22, %s140_s22 }
  0x3b   :  { %p250_p10 = scmp.ne.s32.totalorder %s140_s22, %s249_s23  ;;  %p255_p12 = scmp.lt.s32.totalorder %s249_s23, %s249_s23 }
  0x3c   :  { %170 = vmatmul.mubr.msk.bf16.vlgmr.msra.gmra.mrb[0].mxu0 %vm77_vm1, %v182_v2 }
  0x3d   :  { %p256_p13 = por %p255_p12, %p254_p11 }
  0x3f   :  { %p257_p0 = pnand %p256_p13, %p250_p10 }
 0x10f   :  { %v115_v4 = vpop.f32.mrb[0].mxu0 }
 0x110   :  { %v116_v5 = vadd.f32 %v152_v3, %v115_v4  ;;  %v171_v6 = vpop.f32.mrb[1].mxu0 }
 0x111   :  { %v118_v7 = vpop.f32.mrb[2].mxu0 }
 0x112   :  { %v119_v8 = vadd.f32 %v152_v3, %v118_v7  ;;  %v172_v9 = vpop.f32.mrb[3].mxu0  ;;  %v122_v10 = vmax.f32 %v116_v5, 0.0 }
 0x114   :  { %v123_v11 = vmax.f32 %v119_v8, 0.0 }
 0x116   :  { %v163_v12 = vpack.c.bf16 %v123_v11, %v122_v10 }
 0x118   :  { %164 = vst [vmem:[#allocation8] sm:$0xff] %v163_v12  }
 0x119   :  { %260 = shalt.err (!%p257_p0)
}
 0x11a   :  { %s261_s28 = scalar_lea.hbm %s372_s3, 128 }
 0x11b   :  { %p262_p1 = scmp.ne.s32.totalorder %s372_s3, %s261_s28  ;;  %p265_p2 = scmp.lt.u32.totalorder %s261_s28, %s372_s3 }
 0x11d   :  { %p267_p3 = pnand %p265_p2, %p262_p1 }
 0x11f   :  { %270 = shalt.err (!%p267_p3)
}
 0x120   :  { %145 = dma.vmem_to_hbm [thread:$0]  %s140_s22, 128, %s372_s3, [#allocation4], %s279_s24, %s279_s24, %s280_s25  }
 0x121   :  { %275 = dma.done.wait [#allocation4], 128  }
 0x122   :  { %276 = vsyncadd [#allocation4], 4294967168 }
 0x123   :  { %149 = vsyncpa [#allocation3], 1 }
 0x124   :  { %150 = vsyncpa [#allocation6], 1 }
 0x125   :  { %151 = vsyncpa [#allocation4], 1 }

// kernel: tpu_custom_call.1
= control target key start
LH: loop header
LB: loop body
LE: loop exit
PB: predicated region body
PF: predicated region fallthrough
CT: control target
= control target key end

     0   :  { %8 = vsyncpa [#allocation3], 0  ;;  %s369_s0 = inlined_call_operand.hbm [shape: bf16[16,16], index: 0, kind: input, shape index: {}]   ;;  %s370_s1 = inlined_call_operand.hbm [shape: bf16[16,128], index: 1, kind: input, shape index: {}]   ;;  %s371_s2 = inlined_call_operand.hbm [shape: f32[1,128], index: 2, kind: input, shape index: {}]   ;;  %s372_s3 = inlined_call_operand.hbm [shape: bf16[16,128], index: 3, kind: output, shape index: {}]  }
   0x1   :  { %9 = vsyncpa [#allocation6], 0 }
   0x2   :  { %10 = vsyncpa [#allocation4], 0  ;;  %s277_s12 = smov [#allocation5]   ;;  %s278_s14 = smov [#allocation2]  }
   0x3   :  { %s28_s13 = sshll.u32 %s277_s12, 4  ;;  %s16_s15 = sshll.u32 %s278_s14, 4  ;;  %s29_s13 = int_to_ptr.vmem [resolvable:$true] %s28_s13  ;;  %s305_s15 = int_to_ptr.vmem [resolvable:$true] %s16_s15 }
   0x4   :  { %s183_s18 = scalar_lea.hbm %s370_s1, 128 }
   0x5   :  { %p184_p0 = scmp.ne.s32.totalorder %s370_s1, %s183_s18  ;;  %p187_p1 = scmp.lt.u32.totalorder %s183_s18, %s370_s1 }
   0x7   :  { %p189_p2 = pnand %p187_p1, %p184_p0 }
   0x9   :  { %192 = shalt.err (!%p189_p2)
}
   0xa   :  { %s193_s23 = scalar_lea.vmem %s29_s13, 128  ;;  %p198_p4 = scmp.lt.s32.totalorder %s29_s13, %s29_s13 }
   0xb   :  { %p194_p3 = scmp.ne.s32.totalorder %s29_s13, %s193_s23  ;;  %p199_p5 = scmp.lt.s32.totalorder %s193_s23, %s193_s23 }
   0xd   :  { %p200_p6 = por %p199_p5, %p198_p4 }
   0xf   :  { %p201_p7 = pnand %p200_p6, %p194_p3 }
  0x11   :  { %204 = shalt.err (!%p201_p7)
}
  0x12   :  { %s279_s24 = smov 64   ;;  %s280_s25 = smov 4  }
  0x13   :  { %34 = dma.hbm_to_vmem [thread:$0]  %s370_s1, 128, %s29_s13, [#allocation6], %s279_s24, %s279_s24, %s280_s25  }
  0x14   :  { %s205_s30 = scalar_lea.hbm %s369_s0, 128 }
  0x15   :  { %p206_p8 = scmp.ne.s32.totalorder %s369_s0, %s205_s30  ;;  %p209_p9 = scmp.lt.u32.totalorder %s205_s30, %s369_s0 }
  0x17   :  { %p211_p10 = pnand %p209_p9, %p206_p8 }
  0x19   :  { %214 = shalt.err (!%p211_p10)
}
  0x1a   :  { %s215_s8 = scalar_lea.vmem %s305_s15, 128  ;;  %p220_p12 = scmp.lt.s32.totalorder %s305_s15, %s305_s15 }
  0x1b   :  { %p216_p11 = scmp.ne.s32.totalorder %s305_s15, %s215_s8  ;;  %p221_p13 = scmp.lt.s32.totalorder %s215_s8, %s215_s8 }
  0x1d   :  { %p222_p0 = por %p221_p13, %p220_p12 }
  0x1f   :  { %p223_p1 = pnand %p222_p0, %p216_p11 }
  0x21   :  { %226 = shalt.err (!%p223_p1)
}
  0x22   :  { %22 = dma.hbm_to_vmem [thread:$0]  %s369_s0, 128, %s305_s15, [#allocation3], %s279_s24, %s279_s24, %s280_s25  }
  0x23   :  { %s281_s10 = smov [#allocation7]   ;;  %s227_s14 = scalar_lea.hbm %s371_s2, 16 }
  0x24   :  { %s41_s11 = sshll.u32 %s281_s10, 4  ;;  %p228_p2 = scmp.ne.s32.totalorder %s371_s2, %s227_s14  ;;  %s42_s11 = int_to_ptr.vmem [resolvable:$true] %s41_s11 }
  0x25   :  { %p231_p3 = scmp.lt.u32.totalorder %s227_s14, %s371_s2 }
  0x27   :  { %p233_p4 = pnand %p231_p3, %p228_p2 }
  0x29   :  { %236 = shalt.err (!%p233_p4)
}
  0x2a   :  { %s237_s20 = scalar_lea.vmem %s42_s11, 16  ;;  %s241_s0 = scalar_lea.vmem %s42_s11, 32 }
  0x2b   :  { %p238_p5 = scmp.ne.s32.totalorder %s42_s11, %s237_s20  ;;  %p242_p6 = scmp.lt.s32.totalorder %s42_s11, %s42_s11 }
  0x2c   :  { %p243_p7 = scmp.lt.s32.totalorder %s241_s0, %s237_s20 }
  0x2e   :  { %p244_p8 = por %p243_p7, %p242_p6 }
  0x30   :  { %p245_p9 = pnand %p244_p8, %p238_p5 }
  0x32   :  { %248 = shalt.err (!%p245_p9)
}
  0x33   :  { %44 = dma.hbm_to_vmem [thread:$0]  %s371_s2, 16, %s42_s11, [#allocation6]  }
  0x34   :  { %271 = dma.done.wait [#allocation3], 128  }
  0x35   :  { %272 = vsyncadd [#allocation3], 4294967168 }
  0x36   :  { %273 = dma.done.wait [#allocation6], 144  }
  0x37   :  { %274 = vsyncadd [#allocation6], 4294967152  ;;  %v282_v0 = vmov 0.0   ;;  %vm283_vm0 = vmmov 0   ;;  %v181_v1 = vld [vmem:[#allocation5] sm:$0xff]   ;;  %v182_v2 = vld [vmem:[#allocation2] sm:$0xff]  }
  0x38   :  { %167 = vmatprep.subr.bf16.mxu0 %v282_v0  ;;  %169 = vmatprep.mubr.msk.bf16.mxu0 %vm283_vm0, %v282_v0  ;;  %vm77_vm1 = vcmask 130048   ;;  %v152_v3 = vld [vmem:[#allocation7] ss:$0 sm:$0xff]  ;;  %s284_s2 = smov [#allocation8]  }
  0x39   :  { %168 = vmatpush3.bf16.msra.mxu0 %v181_v1  ;;  %s139_s22 = sshll.u32 %s284_s2, 4  ;;  %s140_s22 = int_to_ptr.vmem [resolvable:$true] %s139_s22 }
  0x3a   :  { %s249_s23 = scalar_lea.vmem %s140_s22, 128  ;;  %p254_p11 = scmp.lt.s32.totalorder %s140_s22, %s140_s22 }
  0x3b   :  { %p250_p10 = scmp.ne.s32.totalorder %s140_s22, %s249_s23  ;;  %p255_p12 = scmp.lt.s32.totalorder %s249_s23, %s249_s23 }
  0x3c   :  { %170 = vmatmul.mubr.msk.bf16.vlgmr.msra.gmra.mrb[0].mxu0 %vm77_vm1, %v182_v2 }
  0x3d   :  { %p256_p13 = por %p255_p12, %p254_p11 }
  0x3f   :  { %p257_p0 = pnand %p256_p13, %p250_p10 }
 0x10f   :  { %v115_v4 = vpop.f32.mrb[0].mxu0 }
 0x110   :  { %v116_v5 = vadd.f32 %v152_v3, %v115_v4  ;;  %v171_v6 = vpop.f32.mrb[1].mxu0 }
 0x111   :  { %v118_v7 = vpop.f32.mrb[2].mxu0 }
 0x112   :  { %v119_v8 = vadd.f32 %v152_v3, %v118_v7  ;;  %v172_v9 = vpop.f32.mrb[3].mxu0  ;;  %v122_v10 = vmax.f32 %v116_v5, 0.0 }
 0x114   :  { %v123_v11 = vmax.f32 %v119_v8, 0.0 }
 0x116   :  { %v163_v12 = vpack.c.bf16 %v123_v11, %v122_v10 }
 0x118   :  { %164 = vst [vmem:[#allocation8] sm:$0xff] %v163_v12  }
 0x119   :  { %260 = shalt.err (!%p257_p0)
}
 0x11a   :  { %s261_s28 = scalar_lea.hbm %s372_s3, 128 }
 0x11b   :  { %p262_p1 = scmp.ne.s32.totalorder %s372_s3, %s261_s28  ;;  %p265_p2 = scmp.lt.u32.totalorder %s261_s28, %s372_s3 }
 0x11d   :  { %p267_p3 = pnand %p265_p2, %p262_p1 }
 0x11f   :  { %270 = shalt.err (!%p267_p3)
}
 0x120   :  { %145 = dma.vmem_to_hbm [thread:$0]  %s140_s22, 128, %s372_s3, [#allocation4], %s279_s24, %s279_s24, %s280_s25  }
 0x121   :  { %275 = dma.done.wait [#allocation4], 128  }
 0x122   :  { %276 = vsyncadd [#allocation4], 4294967168 }
 0x123   :  { %149 = vsyncpa [#allocation3], 1 }
 0x124   :  { %150 = vsyncpa [#allocation6], 1 }
 0x125   :  { %151 = vsyncpa [#allocation4], 1 }

</bundles_post_ra>
